<compile_context>
chip_gen: v6e
topology: v6e:2x2x1
jax: 0.10.0
libtpu: 0.0.40
codegen_flags: <defaults>
</compile_context>

<pallas_src>
import functools

import jax
import jax.numpy as jnp
from jax import lax
from jax.experimental import pallas as pl
from jax.experimental.pallas import tpu as pltpu

_LANE = 128
_SUBLANE = 8
_MAX_ROW_TILE = 2048            # rows (of 128 lanes) per grid step, upper cap
_NUM_CORE_SPLITS = 2            # leading "parallel" axis width (v7x has 2 TCs)


def _round_up(x, m):
    return ((x + m - 1) // m) * m


def _vmem_budgets():
    """(input-block budget, scoped vmem_limit_bytes) sized per TPU generation."""
    try:
        cap = int(pltpu.get_tpu_info().vmem_capacity_bytes)
    except Exception:
        cap = 0
    if cap >= 100 * 1024 * 1024:          # v5e / v6e: 128 MiB physical VMEM
        return 40 * 1024 * 1024, 80 * 1024 * 1024
    # v7x (64 MiB physical, 32 MiB scoped default) or unknown: stay modest and
    # leave headroom for f32 cast/reduce temporaries + compiler scratch.
    return 20 * 1024 * 1024, 48 * 1024 * 1024


def _r2_stats_kernel(*refs, has_mask, row_tile, steps_per_core, rows,
                     needs_tail_mask):
    if has_mask:
        pred_ref, target_ref, mask_ref, st_ref, st2_ref, srss_ref, sm_ref = refs
    else:
        pred_ref, target_ref, st_ref, st2_ref, srss_ref = refs
        mask_ref = sm_ref = None

    i = pl.program_id(1)                  # row-stream step within this core

    @pl.when(i == 0)
    def _init():
        st_ref[...] = jnp.zeros_like(st_ref)
        st2_ref[...] = jnp.zeros_like(st2_ref)
        srss_ref[...] = jnp.zeros_like(srss_ref)
        if has_mask:
            sm_ref[...] = jnp.zeros_like(sm_ref)

    # (B, row_tile, 128) tile in native dtype; upcast after the load so HBM
    # traffic stays narrow (bf16 inputs / int8 mask supported).
    t = target_ref[...].astype(jnp.float32)
    p = pred_ref[...].astype(jnp.float32)
    m = mask_ref[...].astype(jnp.float32) if has_mask else None

    if needs_tail_mask:
        # Kill rows beyond the true row count (ragged last tile and/or the
        # over-hanging steps of the second core).  OOB block contents are
        # undefined (possibly NaN/inf), so select to zero -- never rely on *0.
        step = pl.program_id(0) * steps_per_core + i
        row0 = step * row_tile
        row_ids = lax.broadcasted_iota(jnp.int32, (row_tile, _LANE), 0)
        valid = ((row_ids + row0) < rows)[None]        # (1, row_tile, 128)
        t = jnp.where(valid, t, 0.0)
        p = jnp.where(valid, p, 0.0)
        if has_mask:
            m = jnp.where(valid, m, 0.0)

    if has_mask:
        tm = t * m                 # masked target
        d = (t - p) * m            # == target*mask - pred*mask
    else:
        tm = t
        d = t - p

    def fold(x):
        # Sum sublane-aligned (B, 8, 128) chunks: pure VALU vreg adds, no XLU.
        # (Equivalent to summing axis 1 of a (B, TR//8, 8, 128) view.)
        if row_tile == _SUBLANE:
            return x
        acc = x[:, 0:_SUBLANE, :]
        for j in range(1, row_tile // _SUBLANE):
            acc = acc + x[:, j * _SUBLANE:(j + 1) * _SUBLANE, :]
        return acc

    st_ref[...] += fold(tm)[None]
    st2_ref[...] += fold(tm * tm)[None]
    srss_ref[...] += fold(d * d)[None]
    if has_mask:
        sm_ref[...] += fold(m)[None]


def r2_loss(pred, target, mask=None, *, reduction="mean", row_tile=None,
            num_core_splits=_NUM_CORE_SPLITS):
    """Pallas equivalent of R2Loss.forward.  pred/target/mask: (B, C, H, W)."""
    if reduction not in ("mean", "sum"):
        raise ValueError(f"unsupported reduction: {reduction}")
    if mask is not None and mask.shape != pred.shape:
        raise ValueError("mask must match pred/target shape")

    B = target.shape[0]
    n_total = int(pred.size) // B           # true per-batch element count
    has_mask = mask is not None
    inputs = [pred, target] + ([mask] if has_mask else [])
    n_inputs = len(inputs)

    # Lane-dense view (B, rows, 128).  Common path (n_total a multiple of 128,
    # >= 8*128) is a FREE reshape; otherwise a small zero pad (zeros contribute
    # nothing to any statistic; n_total below stays the exact element count).
    rows = int(max(_SUBLANE, pl.cdiv(n_total, _LANE)))

    def prep(x):
        x = x.reshape(B, -1)
        if x.shape[1] != rows * _LANE:
            x = jnp.pad(x, ((0, 0), (0, rows * _LANE - x.shape[1])))
        return x.reshape(B, rows, _LANE)

    # --- row-tile selection: derive the tile from the step count; the ragged
    # tail is masked in-kernel (no padding of the row axis). ---
    input_budget, vmem_limit = _vmem_budgets()
    row_cap = max(_SUBLANE, (rows // _SUBLANE) * _SUBLANE)   # block dim <= rows
    if row_tile is None:
        itemsize_sum = sum(x.dtype.itemsize for x in inputs)
        # double-buffered native-dtype input blocks + ~4 block-sized f32 temps
        bytes_per_row = B * _LANE * (2 * itemsize_sum + 4 * 4)
        row_tile = max(_SUBLANE, input_budget // bytes_per_row)
    row_tile = min(_MAX_ROW_TILE, int(row_tile), row_cap)
    row_tile = max(_SUBLANE, (row_tile // _SUBLANE) * _SUBLANE)
    num_steps = int(pl.cdiv(rows, row_tile))
    row_tile = min(row_cap, _round_up(int(pl.cdiv(rows, num_steps)), _SUBLANE))
    num_steps = int(pl.cdiv(rows, row_tile))

    # --- split the row stream across TensorCores (2 on v7x; a harmless serial
    # outer loop on 1-TC v5e/v6e). ---
    n_cores = max(1, min(int(num_core_splits), num_steps))
    steps_per_core = int(pl.cdiv(num_steps, n_cores))
    needs_tail_mask = n_cores * steps_per_core * row_tile > rows

    def in_index_map(c, i):
        s = c * steps_per_core + i
        # Clamp so over-hanging steps of the last core never DMA out of range;
        # their contribution is zeroed by the in-kernel row mask.
        s = jnp.minimum(s, num_steps - 1)
        return (0, s, 0)

    in_block = (B, row_tile, _LANE)
    stat_shape = (n_cores, B, _SUBLANE, _LANE)
    stat_spec = pl.BlockSpec((1, B, _SUBLANE, _LANE), lambda c, i: (c, 0, 0, 0))
    n_stats = 4 if has_mask else 3

    kernel = functools.partial(
        _r2_stats_kernel,
        has_mask=has_mask,
        row_tile=row_tile,
        steps_per_core=steps_per_core,
        rows=rows,
        needs_tail_mask=needs_tail_mask,
    )

    stats = pl.pallas_call(
        kernel,
        out_shape=tuple(jax.ShapeDtypeStruct(stat_shape, jnp.float32)
                        for _ in range(n_stats)),
        grid_spec=pltpu.PrefetchScalarGridSpec(
            num_scalar_prefetch=0,
            grid=(n_cores, steps_per_core),
            in_specs=[pl.BlockSpec(in_block, in_index_map)
                      for _ in range(n_inputs)],
            out_specs=tuple(stat_spec for _ in range(n_stats)),
        ),
        compiler_params=pltpu.CompilerParams(
            dimension_semantics=("parallel", "arbitrary"),
            vmem_limit_bytes=vmem_limit,
        ),
    )(*[prep(x) for x in inputs])

    # --- finalize in plain JAX (O(B) work, off the kernel's hot path). ---
    if has_mask:
        s_t, s_t2, s_rss, s_m = stats
    else:
        s_t, s_t2, s_rss = stats
    st = jnp.sum(s_t, axis=(0, 2, 3))        # (B,)
    st2 = jnp.sum(s_t2, axis=(0, 2, 3))
    rss = jnp.sum(s_rss, axis=(0, 2, 3))
    n_f = jnp.float32(n_total)
    msum = jnp.sum(s_m, axis=(0, 2, 3)) if has_mask else n_f
    mean = st / msum
    # tss over ALL n_total positions of (target*mask - mean)^2, matching the
    # PyTorch reference (masked-out elements contribute mean^2 each).
    tss = st2 - 2.0 * mean * st + n_f * (mean * mean)
    r2 = rss / tss
    return jnp.mean(r2) if reduction == "mean" else jnp.sum(r2)


def _reference_r2_loss(pred, target, mask=None, reduction="mean"):
    # Pure-JAX reference mirroring the PyTorch module, for correctness checks.
    B = target.shape[0]
    if mask is None:
        mask = jnp.ones_like(pred)
    mask = mask.astype(pred.dtype)
    pred = pred * mask
    target = target * mask
    mask_f = mask.reshape(B, -1)
    target_f = target.reshape(B, -1)
    pred_f = pred.reshape(B, -1)
    t_mean = jnp.sum(target_f, axis=-1, keepdims=True) / jnp.sum(
        mask_f, axis=-1, keepdims=True)
    rss = jnp.sum(jnp.square(target_f - pred_f), axis=-1)
    tss = jnp.sum(jnp.square(target_f - t_mean), axis=-1)
    r2 = rss / tss
    return jnp.mean(r2) if reduction == "mean" else jnp.sum(r2)


if __name__ == "__main__":
    key = jax.random.PRNGKey(0)
    k1, k2, k3 = jax.random.split(key, 3)

    def make(shape):
        p = jax.random.normal(k1, shape, dtype=jnp.float32)
        t = jax.random.normal(k2, shape, dtype=jnp.float32)
        m = (jax.random.uniform(k3, shape) > 0.3).astype(jnp.float32)
        return p, t, m

    checks = []

    # Small shape implied by the module: (B, C, H, W) = (2, 4, 16, 16).
    pred, target, mask = make((2, 4, 16, 16))
    checks.append((r2_loss(pred, target), _reference_r2_loss(pred, target)))
    checks.append((r2_loss(pred, target, mask),
                   _reference_r2_loss(pred, target, mask)))
    checks.append((r2_loss(pred, target, mask, reduction="sum"),
                   _reference_r2_loss(pred, target, mask, reduction="sum")))
    # int8 mask kept narrow in HBM (dtype-shrink path); reference uses f32 view.
    checks.append((r2_loss(pred, target, mask.astype(jnp.int8)),
                   _reference_r2_loss(pred, target, mask)))

    # Larger spatial size with a forced small row tile: multi-step streaming
    # accumulators + the two-core row split (grid = (2, 2)).
    pred2, target2, mask2 = make((2, 4, 64, 64))
    checks.append((r2_loss(pred2, target2, mask2, row_tile=32),
                   _reference_r2_loss(pred2, target2, mask2)))
    checks.append((r2_loss(pred2, target2, row_tile=32),
                   _reference_r2_loss(pred2, target2)))

    # Ragged row count (rows = 15, not a multiple of the 8-row tile):
    # exercises the in-kernel tail mask with zero input padding.
    pred3, target3, mask3 = make((2, 3, 20, 32))
    checks.append((r2_loss(pred3, target3, mask3),
                   _reference_r2_loss(pred3, target3, mask3)))

    # n_total not a multiple of 128: rare small-pad fallback path.
    pred4, target4, mask4 = make((2, 3, 10, 10))
    checks.append((r2_loss(pred4, target4, mask4),
                   _reference_r2_loss(pred4, target4, mask4)))
    checks.append((r2_loss(pred4, target4),
                   _reference_r2_loss(pred4, target4)))

    for got, want in checks:
        got = jax.block_until_ready(got)
        want = jax.block_until_ready(want)
        assert jnp.allclose(got, want, rtol=1e-4, atol=1e-6), (got, want)

    print("KERNEL_OK")
</pallas_src>

<mosaic_0001>
module attributes {stable_mosaic.version = 11 : i64} {
  func.func @_r2_stats_kernel(%arg0: i32, %arg1: i32, %arg2: memref<2x8x128xf32, #tpu.memory_space<vmem>>, %arg3: memref<2x8x128xf32, #tpu.memory_space<vmem>>, %arg4: memref<1x2x8x128xf32, #tpu.memory_space<vmem>>, %arg5: memref<1x2x8x128xf32, #tpu.memory_space<vmem>>, %arg6: memref<1x2x8x128xf32, #tpu.memory_space<vmem>>) attributes {dimension_semantics = [#tpu.dimension_semantics<parallel>, #tpu.dimension_semantics<arbitrary>], iteration_bounds = array<i64: 1, 1>, scalar_prefetch = 0 : i64, scratch_operands = 0 : i64, tpu.core_type = #tpu.core_type<tc>, window_params = [{transform_indices = @transform_0, window_bounds = array<i64: 2, 8, 128>}, {transform_indices = @transform_1, window_bounds = array<i64: 2, 8, 128>}, {transform_indices = @transform_2, window_bounds = array<i64: 1, 2, 8, 128>}, {transform_indices = @transform_3, window_bounds = array<i64: 1, 2, 8, 128>}, {transform_indices = @transform_4, window_bounds = array<i64: 1, 2, 8, 128>}]} {
    %c0_i32 = arith.constant 0 : i32
    %0 = arith.cmpi eq, %arg1, %c0_i32 : i32
    %1 = arith.extui %0 : i1 to i32
    %c0_i32_0 = arith.constant 0 : i32
    %2 = arith.cmpi ne, %1, %c0_i32_0 : i32
    scf.if %2 {
      %cst = arith.constant 0.000000e+00 : f32
      %20 = vector.broadcast %cst : f32 to vector<1x2x8x128xf32>
      %c0_30 = arith.constant 0 : index
      %c0_31 = arith.constant 0 : index
      %c0_32 = arith.constant 0 : index
      %c0_33 = arith.constant 0 : index
      %21 = vector.load %arg4[%c0_30, %c0_31, %c0_32, %c0_33] : memref<1x2x8x128xf32, #tpu.memory_space<vmem>>, vector<1x2x8x128xf32>
      tpu.vector_store %arg4[%c0_30, %c0_31, %c0_32, %c0_33], %20 {strides = array<i32>} : memref<1x2x8x128xf32, #tpu.memory_space<vmem>>, vector<1x2x8x128xf32>,
      %cst_34 = arith.constant 0.000000e+00 : f32
      %22 = vector.broadcast %cst_34 : f32 to vector<1x2x8x128xf32>
      %c0_35 = arith.constant 0 : index
      %c0_36 = arith.constant 0 : index
      %c0_37 = arith.constant 0 : index
      %c0_38 = arith.constant 0 : index
      %23 = vector.load %arg5[%c0_35, %c0_36, %c0_37, %c0_38] : memref<1x2x8x128xf32, #tpu.memory_space<vmem>>, vector<1x2x8x128xf32>
      tpu.vector_store %arg5[%c0_35, %c0_36, %c0_37, %c0_38], %22 {strides = array<i32>} : memref<1x2x8x128xf32, #tpu.memory_space<vmem>>, vector<1x2x8x128xf32>,
      %cst_39 = arith.constant 0.000000e+00 : f32
      %24 = vector.broadcast %cst_39 : f32 to vector<1x2x8x128xf32>
      %c0_40 = arith.constant 0 : index
      %c0_41 = arith.constant 0 : index
      %c0_42 = arith.constant 0 : index
      %c0_43 = arith.constant 0 : index
      %25 = vector.load %arg6[%c0_40, %c0_41, %c0_42, %c0_43] : memref<1x2x8x128xf32, #tpu.memory_space<vmem>>, vector<1x2x8x128xf32>
      tpu.vector_store %arg6[%c0_40, %c0_41, %c0_42, %c0_43], %24 {strides = array<i32>} : memref<1x2x8x128xf32, #tpu.memory_space<vmem>>, vector<1x2x8x128xf32>,
    } else {
    }
    %c0 = arith.constant 0 : index
    %c0_1 = arith.constant 0 : index
    %c0_2 = arith.constant 0 : index
    %3 = vector.load %arg3[%c0, %c0_1, %c0_2] : memref<2x8x128xf32, #tpu.memory_space<vmem>>, vector<2x8x128xf32>
    %c0_3 = arith.constant 0 : index
    %c0_4 = arith.constant 0 : index
    %c0_5 = arith.constant 0 : index
    %4 = vector.load %arg2[%c0_3, %c0_4, %c0_5] : memref<2x8x128xf32, #tpu.memory_space<vmem>>, vector<2x8x128xf32>
    %5 = arith.subf %3, %4 : vector<2x8x128xf32>
    %c0_6 = arith.constant 0 : index
    %c0_7 = arith.constant 0 : index
    %c0_8 = arith.constant 0 : index
    %c0_9 = arith.constant 0 : index
    %6 = vector.load %arg4[%c0_6, %c0_7, %c0_8, %c0_9] : memref<1x2x8x128xf32, #tpu.memory_space<vmem>>, vector<1x2x8x128xf32>
    %7 = vector.shape_cast %3 : vector<2x8x128xf32> to vector<1x2x8x128xf32>
    %8 = arith.addf %6, %7 : vector<1x2x8x128xf32>
    %c0_10 = arith.constant 0 : index
    %c0_11 = arith.constant 0 : index
    %c0_12 = arith.constant 0 : index
    %c0_13 = arith.constant 0 : index
    %9 = vector.load %arg4[%c0_10, %c0_11, %c0_12, %c0_13] : memref<1x2x8x128xf32, #tpu.memory_space<vmem>>, vector<1x2x8x128xf32>
    tpu.vector_store %arg4[%c0_10, %c0_11, %c0_12, %c0_13], %8 {strides = array<i32>} : memref<1x2x8x128xf32, #tpu.memory_space<vmem>>, vector<1x2x8x128xf32>,
    %c0_14 = arith.constant 0 : index
    %c0_15 = arith.constant 0 : index
    %c0_16 = arith.constant 0 : index
    %c0_17 = arith.constant 0 : index
    %10 = vector.load %arg5[%c0_14, %c0_15, %c0_16, %c0_17] : memref<1x2x8x128xf32, #tpu.memory_space<vmem>>, vector<1x2x8x128xf32>
    %11 = arith.mulf %3, %3 : vector<2x8x128xf32>
    %12 = vector.shape_cast %11 : vector<2x8x128xf32> to vector<1x2x8x128xf32>
    %13 = arith.addf %10, %12 : vector<1x2x8x128xf32>
    %c0_18 = arith.constant 0 : index
    %c0_19 = arith.constant 0 : index
    %c0_20 = arith.constant 0 : index
    %c0_21 = arith.constant 0 : index
    %14 = vector.load %arg5[%c0_18, %c0_19, %c0_20, %c0_21] : memref<1x2x8x128xf32, #tpu.memory_space<vmem>>, vector<1x2x8x128xf32>
    tpu.vector_store %arg5[%c0_18, %c0_19, %c0_20, %c0_21], %13 {strides = array<i32>} : memref<1x2x8x128xf32, #tpu.memory_space<vmem>>, vector<1x2x8x128xf32>,
    %c0_22 = arith.constant 0 : index
    %c0_23 = arith.constant 0 : index
    %c0_24 = arith.constant 0 : index
    %c0_25 = arith.constant 0 : index
    %15 = vector.load %arg6[%c0_22, %c0_23, %c0_24, %c0_25] : memref<1x2x8x128xf32, #tpu.memory_space<vmem>>, vector<1x2x8x128xf32>
    %16 = arith.mulf %5, %5 : vector<2x8x128xf32>
    %17 = vector.shape_cast %16 : vector<2x8x128xf32> to vector<1x2x8x128xf32>
    %18 = arith.addf %15, %17 : vector<1x2x8x128xf32>
    %c0_26 = arith.constant 0 : index
    %c0_27 = arith.constant 0 : index
    %c0_28 = arith.constant 0 : index
    %c0_29 = arith.constant 0 : index
    %19 = vector.load %arg6[%c0_26, %c0_27, %c0_28, %c0_29] : memref<1x2x8x128xf32, #tpu.memory_space<vmem>>, vector<1x2x8x128xf32>
    tpu.vector_store %arg6[%c0_26, %c0_27, %c0_28, %c0_29], %18 {strides = array<i32>} : memref<1x2x8x128xf32, #tpu.memory_space<vmem>>, vector<1x2x8x128xf32>,
    return
  }
  func.func @transform_0(%arg0: i32, %arg1: i32) -> (i32, i32, i32) {
    %c1_i32 = arith.constant 1 : i32
    %0 = arith.muli %arg0, %c1_i32 : i32
    %1 = arith.addi %0, %arg1 : i32
    %c0_i32 = arith.constant 0 : i32
    %2 = arith.minsi %1, %c0_i32 : i32
    %c0_i32_0 = arith.constant 0 : i32
    %c0_i32_1 = arith.constant 0 : i32
    %c0_i32_2 = arith.constant 0 : i32
    return %c0_i32_0, %2, %c0_i32_1 : i32, i32, i32
  }
  func.func @transform_1(%arg0: i32, %arg1: i32) -> (i32, i32, i32) {
    %c1_i32 = arith.constant 1 : i32
    %0 = arith.muli %arg0, %c1_i32 : i32
    %1 = arith.addi %0, %arg1 : i32
    %c0_i32 = arith.constant 0 : i32
    %2 = arith.minsi %1, %c0_i32 : i32
    %c0_i32_0 = arith.constant 0 : i32
    %c0_i32_1 = arith.constant 0 : i32
    %c0_i32_2 = arith.constant 0 : i32
    return %c0_i32_0, %2, %c0_i32_1 : i32, i32, i32
  }
  func.func @transform_2(%arg0: i32, %arg1: i32) -> (i32, i32, i32, i32) {
    %c0_i32 = arith.constant 0 : i32
    %c0_i32_0 = arith.constant 0 : i32
    %c0_i32_1 = arith.constant 0 : i32
    %c0_i32_2 = arith.constant 0 : i32
    return %arg0, %c0_i32, %c0_i32_0, %c0_i32_1 : i32, i32, i32, i32
  }
  func.func @transform_3(%arg0: i32, %arg1: i32) -> (i32, i32, i32, i32) {
    %c0_i32 = arith.constant 0 : i32
    %c0_i32_0 = arith.constant 0 : i32
    %c0_i32_1 = arith.constant 0 : i32
    %c0_i32_2 = arith.constant 0 : i32
    return %arg0, %c0_i32, %c0_i32_0, %c0_i32_1 : i32, i32, i32, i32
  }
  func.func @transform_4(%arg0: i32, %arg1: i32) -> (i32, i32, i32, i32) {
    %c0_i32 = arith.constant 0 : i32
    %c0_i32_0 = arith.constant 0 : i32
    %c0_i32_1 = arith.constant 0 : i32
    %c0_i32_2 = arith.constant 0 : i32
    return %arg0, %c0_i32, %c0_i32_0, %c0_i32_1 : i32, i32, i32, i32
  }
}

</mosaic_0001>

<bundles_post_ra>
// kernel: tpu_custom_call.1
= control target key start
LH: loop header
LB: loop body
LE: loop exit
PB: predicated region body
PF: predicated region fallthrough
CT: control target
= control target key end

     0   :  { %10 = vsyncpa [#allocation3], 0  ;;  %s329_s0 = inlined_call_operand.hbm [shape: f32[2,8,128], index: 0, kind: input, shape index: {}]   ;;  %s330_s1 = inlined_call_operand.hbm [shape: f32[2,8,128], index: 1, kind: input, shape index: {}]   ;;  %s331_s2 = inlined_call_operand.hbm [shape: f32[1,2,8,128], index: 2, kind: output, shape index: {0}]   ;;  %s332_s3 = inlined_call_operand.hbm [shape: f32[1,2,8,128], index: 3, kind: output, shape index: {1}]   ;;  %s333_s4 = inlined_call_operand.hbm [shape: f32[1,2,8,128], index: 4, kind: output, shape index: {2}]  }
   0x1   :  { %11 = vsyncpa [#allocation6], 0 }
   0x2   :  { %12 = vsyncpa [#allocation4], 0 }
   0x3   :  { %13 = vsyncpa [#allocation9], 0  ;;  %s267_s15 = smov [#allocation2]  }
   0x4   :  { %s24_s16 = sshll.u32 %s267_s15, 4  ;;  %s25_s16 = int_to_ptr.vmem [resolvable:$true] %s24_s16 }
   0x5   :  { %s167_s17 = scalar_lea.vmem %s25_s16, 256  ;;  %p172_p1 = scmp.lt.s32.totalorder %s25_s16, %s25_s16 }
   0x6   :  { %p168_p0 = scmp.ne.s32.totalorder %s25_s16, %s167_s17  ;;  %p173_p2 = scmp.lt.s32.totalorder %s167_s17, %s167_s17 }
   0x8   :  { %p174_p3 = por %p173_p2, %p172_p1 }
   0xa   :  { %p175_p4 = pnand %p174_p3, %p168_p0 }
   0xc   :  { %178 = shalt.err (!%p175_p4)
}
   0xd   :  { %s268_s18 = smov 128   ;;  %s269_s19 = smov 8  }
   0xe   :  { %30 = dma.hbm_to_vmem [thread:$0]  %s329_s0, 256, %s25_s16, [#allocation3], %s268_s18, %s268_s18, %s269_s19  }
   0xf   :  { %s270_s22 = smov [#allocation5]  }
  0x10   :  { %s41_s23 = sshll.u32 %s270_s22, 4  ;;  %s42_s23 = int_to_ptr.vmem [resolvable:$true] %s41_s23 }
  0x11   :  { %s187_s24 = scalar_lea.vmem %s42_s23, 256  ;;  %p192_p6 = scmp.lt.s32.totalorder %s42_s23, %s42_s23 }
  0x12   :  { %p188_p5 = scmp.ne.s32.totalorder %s42_s23, %s187_s24  ;;  %p193_p7 = scmp.lt.s32.totalorder %s187_s24, %s187_s24 }
  0x14   :  { %p194_p8 = por %p193_p7, %p192_p6 }
  0x16   :  { %p195_p9 = pnand %p194_p8, %p188_p5 }
  0x18   :  { %198 = shalt.err (!%p195_p9)
}
  0x19   :  { %47 = dma.hbm_to_vmem [thread:$0]  %s330_s1, 256, %s42_s23, [#allocation6], %s268_s18, %s268_s18, %s269_s19  }
  0x1a   :  { %259 = dma.done.wait [#allocation3], 256  }
  0x1b   :  { %260 = vsyncadd [#allocation3], 4294967040 }
  0x1c   :  { %261 = dma.done.wait [#allocation6], 256  }
  0x1d   :  { %262 = vsyncadd [#allocation6], 4294967040  ;;  %s271_s0 = smov [#allocation7]   ;;  %v70_v0 = vld [vmem:[#allocation5] sm:$0xff]  ;;  %v71_v1 = vld [vmem:[#allocation5 + $0x8] sm:$0xff]  ;;  %s272_s28 = smov [#allocation8]  }
  0x1e   :  { %s103_s27 = sshll.u32 %s271_s0, 4  ;;  %v72_v2 = vld [vmem:[#allocation2] sm:$0xff]  ;;  %s115_s29 = sshll.u32 %s272_s28, 4  ;;  %v84_v3 = vmul.f32 %v70_v0, %v70_v0  ;;  %v85_v4 = vmul.f32 %v71_v1, %v71_v1  ;;  %v73_v5 = vld [vmem:[#allocation2 + $0x8] sm:$0xff]  ;;  %80 = vst [vmem:[#allocation7] sm:$0xff] %v70_v0  ;;  %81 = vst [vmem:[#allocation7 + $0x8] sm:$0xff] %v71_v1  ;;  %s104_s27 = int_to_ptr.vmem [resolvable:$true] %s103_s27  ;;  %s116_s29 = int_to_ptr.vmem [resolvable:$true] %s115_s29 }
  0x1f   :  { %v74_v6 = vsub.f32 %v70_v0, %v72_v2  ;;  %v75_v7 = vsub.f32 %v71_v1, %v73_v5  ;;  %s273_s30 = smov [#allocation10]   ;;  %s199_s1 = scalar_lea.vmem %s104_s27, 256 }
  0x20   :  { %s127_s5 = sshll.u32 %s273_s30, 4  ;;  %p200_p10 = scmp.ne.s32.totalorder %s104_s27, %s199_s1  ;;  %s128_s5 = int_to_ptr.vmem [resolvable:$true] %s127_s5 }
  0x21   :  { %v92_v8 = vmul.f32 %v74_v6, %v74_v6  ;;  %v93_v9 = vmul.f32 %v75_v7, %v75_v7  ;;  %p204_p11 = scmp.lt.s32.totalorder %s104_s27, %s104_s27  ;;  %p205_p12 = scmp.lt.s32.totalorder %s199_s1, %s199_s1 }
  0x23   :  { %p206_p13 = por %p205_p12, %p204_p11 }
  0x25   :  { %p207_p0 = pnand %p206_p13, %p200_p10 }
  0x27   :  { %210 = shalt.err (!%p207_p0)
}
  0x28   :  { %109 = dma.vmem_to_hbm [thread:$0]  %s104_s27, 256, %s331_s2, [#allocation4], %s268_s18, %s268_s18, %s269_s19   ;;  %88 = vst [vmem:[#allocation8] sm:$0xff] %v84_v3  ;;  %89 = vst [vmem:[#allocation8 + $0x8] sm:$0xff] %v85_v4 }
  0x29   :  { %s219_s8 = scalar_lea.vmem %s116_s29, 256  ;;  %p224_p2 = scmp.lt.s32.totalorder %s116_s29, %s116_s29 }
  0x2a   :  { %p220_p1 = scmp.ne.s32.totalorder %s116_s29, %s219_s8  ;;  %p225_p3 = scmp.lt.s32.totalorder %s219_s8, %s219_s8 }
  0x2c   :  { %p226_p4 = por %p225_p3, %p224_p2 }
  0x2e   :  { %p227_p5 = pnand %p226_p4, %p220_p1 }
  0x30   :  { %230 = shalt.err (!%p227_p5)
}
  0x31   :  { %121 = dma.vmem_to_hbm [thread:$0]  %s116_s29, 256, %s332_s3, [#allocation9], %s268_s18, %s268_s18, %s269_s19   ;;  %96 = vst [vmem:[#allocation10] sm:$0xff] %v92_v8  ;;  %97 = vst [vmem:[#allocation10 + $0x8] sm:$0xff] %v93_v9 }
  0x32   :  { %s239_s2 = scalar_lea.vmem %s128_s5, 256  ;;  %p244_p7 = scmp.lt.s32.totalorder %s128_s5, %s128_s5 }
  0x33   :  { %p240_p6 = scmp.ne.s32.totalorder %s128_s5, %s239_s2  ;;  %p245_p8 = scmp.lt.s32.totalorder %s239_s2, %s239_s2 }
  0x35   :  { %p246_p9 = por %p245_p8, %p244_p7 }
  0x37   :  { %p247_p10 = pnand %p246_p9, %p240_p6 }
  0x39   :  { %250 = shalt.err (!%p247_p10)
}
  0x3a   :  { %133 = dma.vmem_to_hbm [thread:$0]  %s128_s5, 256, %s333_s4, [#allocation9], %s268_s18, %s268_s18, %s269_s19  }
  0x3b   :  { %263 = dma.done.wait [#allocation4], 256  }
  0x3c   :  { %264 = vsyncadd [#allocation4], 4294967040 }
  0x3d   :  { %265 = dma.done.wait [#allocation9], 512  }
  0x3e   :  { %266 = vsyncadd [#allocation9], 4294966784 }
  0x3f   :  { %143 = vsyncpa [#allocation3], 1 }
  0x40   :  { %144 = vsyncpa [#allocation6], 1 }
  0x41   :  { %145 = vsyncpa [#allocation4], 1 }
  0x42   :  { %146 = vsyncpa [#allocation9], 1 }

</bundles_post_ra>
